<compile_context>
chip_gen: v6e
topology: v6e:2x2x1
jax: 0.10.0
libtpu: 0.0.40
codegen_flags: <defaults>
</compile_context>

<pallas_src>
import functools

import jax
import jax.numpy as jnp
from jax.experimental import pallas as pl
from jax.experimental.pallas import tpu as pltpu


def _silu(v):
    return v * jax.nn.sigmoid(v)


def _round_up(v, m):
    return ((v + m - 1) // m) * m


# --------------------------------- kernel -----------------------------------
def _ggb_kernel(minmax_ref, x_ref, bw_ref, pw_ref, at_ref, a_ref, bias_ref,
                p0row_ref, a2row_ref, o_ref, xpad_ref, basis_ref, *,
                order, in_features, out_features, use_bias, compute_dtype):
    f32 = jnp.float32
    cdt = compute_dtype
    fin = in_features
    tb, finp = xpad_ref.shape
    foutp = o_ref.shape[-1]

    # ---- stage x into a lane-dense, zero-padded f32 tile (padding lanes stay exactly 0) ----
    if fin == finp:
        x = x_ref[...]
    else:
        xpad_ref[...] = jnp.zeros((tb, finp), f32)
        xpad_ref[:, :fin] = x_ref[...]
        x = xpad_ref[...]

    # ---- base branch: F.linear(SiLU(x), base_weight); weight pre-transposed ----
    acc = jnp.dot(_silu(x).astype(cdt), bw_ref[...], preferred_element_type=f32)
    # P0 == ones: its projection is batch-invariant -> precomputed column-sum row.
    acc = acc + p0row_ref[...]

    # ---- global min/max normalization (scalars hoisted to the wrapper, read from SMEM) ----
    x_min = minmax_ref[0]
    x_max = minmax_ref[1]
    xn = 2.0 * (x - x_min) / (x_max - x_min + 1e-8) - 1.0

    # ---- Gegenbauer recursion; P1..P_order staged (bf16) for ONE wide projection dot ----
    # SiLU(alpha) was applied (and transposed) once at prep time; nothing batch-invariant
    # is recomputed per grid step.
    lin = jnp.dot(xn.astype(cdt), at_ref[...], preferred_element_type=f32)  # xn @ silu(alpha).T
    if use_bias:
        p_n = 2.0 * (lin + bias_ref[...])
    else:
        p_n = 2.0 * lin
    p_n_c = p_n.astype(cdt)
    basis_ref[:, 0:finp] = p_n_c

    p_nm1 = None
    p_nm1_c = None
    for n in range(1, order):
        first = 2.0 * (n * xn + lin) * p_n
        if n == 1:
            # (n-1)*P0 + 2*P0@alpha with P0 == ones is batch-invariant (precomputed row).
            second = a2row_ref[...]
        else:
            # P_{n-1} @ ((n-1) I + 2 alpha)  ==  (n-1) P_{n-1} + 2 (P_{n-1} @ alpha)
            second = (n - 1.0) * p_nm1 + 2.0 * jnp.dot(
                p_nm1_c, a_ref[...], preferred_element_type=f32)
        p_new = (first - second) / (n + 1.0)
        p_nm1, p_nm1_c = p_n, p_n_c
        p_n = p_new
        p_n_c = p_n.astype(cdt)
        basis_ref[:, n * finp:(n + 1) * finp] = p_n_c

    # Single K = order*FinP projection matmul (fills the 256-wide MXU on v6e/v7x).
    acc = acc + jnp.dot(basis_ref[...], pw_ref[...], preferred_element_type=f32)

    # ---- z-score norm over the (unpadded) output features, then SiLU ----
    # TODO(synk): exact z_score_norm definition not provided in the source file;
    # per-row (last-dim) z-score normalization is implemented.
    inv_f = 1.0 / float(out_features)
    mu = jnp.sum(acc, axis=-1, keepdims=True) * inv_f        # padded output cols are exactly 0
    centered = acc - mu
    if out_features == foutp:
        sq = centered * centered
    else:
        col = jax.lax.broadcasted_iota(jnp.int32, acc.shape, 1)
        sq = jnp.where(col < out_features, centered * centered, 0.0)
    var = jnp.sum(sq, axis=-1, keepdims=True) * inv_f
    inv_std = 1.0 / (jnp.sqrt(var) + 1e-8)                   # tiny (TB, 1) tile
    o_ref[...] = _silu(centered * inv_std).astype(o_ref.dtype)


# ------------------------------ parameter prep ------------------------------
def prepare_ggb_params(base_w, poly_w, alpha_w, bias, *, polynomial_order=3,
                       compute_dtype=jnp.bfloat16):
    """One-time layout prep (call at parameter-init time, NOT per forward call)."""
    assert polynomial_order >= 1
    f32 = jnp.float32
    fout, fin = base_w.shape
    order = polynomial_order
    finp = _round_up(fin, 128)
    foutp = _round_up(fout, 128)

    # Base weight, pre-transposed -> (FinP, FoutP), bf16.
    bw = jnp.zeros((finp, foutp), compute_dtype)
    bw = bw.at[:fin, :fout].set(base_w.T.astype(compute_dtype))

    # PyTorch basis layout is feature-major [f0_p0, ..., f0_pN, f1_p0, ...].
    slabs = poly_w.reshape(fout, fin, order + 1)
    # P0 == ones  ->  ones @ W0^T is a batch-invariant column sum; slab 0 is dropped.
    p0row = jnp.zeros((1, foutp), f32)
    p0row = p0row.at[0, :fout].set(jnp.sum(slabs[:, :, 0].astype(f32), axis=1))
    # Slabs 1..order pre-transposed and stacked along K -> one wide projection matmul.
    pw_cat = jnp.zeros((order * finp, foutp), compute_dtype)
    for n in range(1, order + 1):
        pw_cat = pw_cat.at[(n - 1) * finp:(n - 1) * finp + fin, :fout].set(
            slabs[:, :, n].T.astype(compute_dtype))

    # SiLU(alpha) precomputed once (batch-invariant); padded rows/cols stay exactly 0.
    a_silu = _silu(alpha_w.astype(f32))
    alpha = jnp.zeros((finp, finp), compute_dtype)
    alpha = alpha.at[:fin, :fin].set(a_silu.astype(compute_dtype))        # for P @ alpha
    alpha_t = jnp.zeros((finp, finp), compute_dtype)
    alpha_t = alpha_t.at[:fin, :fin].set(a_silu.T.astype(compute_dtype))  # for xn @ alpha.T
    # n == 1 step: 2 * ones @ alpha == 2 * colsum(silu(alpha)), batch-invariant.
    a2row = jnp.zeros((1, finp), f32)
    a2row = a2row.at[0, :fin].set(2.0 * jnp.sum(a_silu, axis=0))

    bvec = jnp.zeros((1, finp), f32)
    bvec = bvec.at[0, :fin].set(bias.astype(f32))

    return bw, pw_cat, alpha_t, alpha, bvec, p0row, a2row


# --------------------------------- forward ----------------------------------
@functools.partial(jax.jit, static_argnames=(
    "in_features", "out_features", "polynomial_order", "use_bias",
    "compute_dtype", "batch_tile"))
def ggb_layer_forward(x, prepared_params, *, in_features, out_features,
                      polynomial_order=3, use_bias=True,
                      compute_dtype=jnp.bfloat16, batch_tile=128):
    assert polynomial_order >= 1
    bw, pw_cat, alpha_t, alpha, bvec, p0row, a2row = prepared_params
    order = polynomial_order
    finp, foutp = bw.shape
    batch = x.shape[0]

    x32 = x.astype(jnp.float32)
    # Global min/max hoisted out of the kernel (tiny reduction over the UNPADDED x).
    minmax = jnp.stack([jnp.min(x32), jnp.max(x32)])

    # Batch tiling.  No wrapper-side copy of x in the common evenly-divisible case;
    # feature-dim padding happens inside the kernel (VMEM scratch), never via HBM.
    tb = min(batch_tile, _round_up(batch, 8))
    b_pad = _round_up(batch, tb)
    if b_pad != batch:
        x32 = jnp.pad(x32, ((0, b_pad - batch), (0, 0)))

    kernel = functools.partial(
        _ggb_kernel, order=order, in_features=in_features,
        out_features=out_features, use_bias=use_bias, compute_dtype=compute_dtype)

    cdt_bytes = jnp.dtype(compute_dtype).itemsize
    # VMEM budget: resident weights (double-buffered by the default pipeline) +
    # streamed x/out blocks + scratch + live temporaries, 1.5x headroom, capped at
    # 48 MiB so the request also leaves headroom on v7x (64 MiB / TensorCore).
    resident = (((1 + order) * finp * foutp + 2 * finp * finp) * cdt_bytes
                + (2 * finp + foutp) * 4)
    streamed = tb * in_features * 4 + tb * foutp * 4
    scratch = tb * finp * 4 + tb * order * finp * cdt_bytes
    temps = 6 * tb * finp * 4 + 3 * tb * foutp * 4
    est = 2 * resident + 2 * streamed + scratch + temps
    vmem_limit = int(min(max(int(est * 1.5), 32 * 1024 * 1024), 48 * 1024 * 1024))

    flops = (2 * b_pad * finp * foutp * (order + 1)
             + 2 * b_pad * finp * finp * max(order - 1, 1))
    cost = pl.CostEstimate(
        flops=int(flops),
        transcendentals=int(b_pad * (finp + foutp)),
        bytes_accessed=int(b_pad * in_features * 4 + b_pad * foutp * 4 + resident))

    out = pl.pallas_call(
        kernel,
        out_shape=jax.ShapeDtypeStruct((b_pad, foutp), jnp.float32),
        grid=(b_pad // tb,),
        in_specs=[
            pl.BlockSpec(memory_space=pltpu.MemorySpace.SMEM),       # min/max scalars
            pl.BlockSpec((tb, in_features), lambda i: (i, 0)),       # x tile (unpadded feats)
            pl.BlockSpec((finp, foutp), lambda i: (0, 0)),           # base_w^T       (resident)
            pl.BlockSpec((order * finp, foutp), lambda i: (0, 0)),   # [W1..Worder]^T (resident)
            pl.BlockSpec((finp, finp), lambda i: (0, 0)),            # silu(alpha)^T  (resident)
            pl.BlockSpec((finp, finp), lambda i: (0, 0)),            # silu(alpha)    (resident)
            pl.BlockSpec((1, finp), lambda i: (0, 0)),               # bias row
            pl.BlockSpec((1, foutp), lambda i: (0, 0)),              # ones @ W0^T row
            pl.BlockSpec((1, finp), lambda i: (0, 0)),               # 2*colsum(silu(alpha))
        ],
        out_specs=pl.BlockSpec((tb, foutp), lambda i: (i, 0)),
        scratch_shapes=[
            pltpu.VMEM((tb, finp), jnp.float32),            # zero-padded x staging
            pltpu.VMEM((tb, order * finp), compute_dtype),  # P1..P_order basis
        ],
        compiler_params=pltpu.CompilerParams(
            dimension_semantics=("parallel",),
            vmem_limit_bytes=vmem_limit),
        cost_estimate=cost,
    )(minmax, x32, bw, pw_cat, alpha_t, alpha, bvec, p0row, a2row)

    return out[:batch, :out_features]


# ------------------- pure-JAX reference (original formulation) --------------
def _reference_original(x, base_w, poly_w, alpha_w, bias, *, polynomial_order=3,
                        use_bias=True):
    """Mirrors the PyTorch forward in float32, including the explicit eye-matrix
    form of the Gegenbauer recursion (independent of the kernel's algebraic
    rewrite and bf16 operand casts)."""
    f32 = jnp.float32
    silu = lambda v: v * jax.nn.sigmoid(v)
    x = x.astype(f32)
    fin = x.shape[1]
    base_out = silu(x) @ base_w.astype(f32).T
    xn = 2.0 * (x - x.min()) / (x.max() - x.min() + 1e-8) - 1.0
    alpha = silu(alpha_w.astype(f32))
    polys = [jnp.ones_like(xn)]
    if polynomial_order >= 1:
        lin = xn @ alpha.T
        polys.append(2.0 * (lin + bias) if use_bias else 2.0 * lin)
        for n in range(1, polynomial_order):
            first = 2.0 * (n * xn + lin) * polys[-1]
            m = (n - 1.0) * jnp.eye(fin, dtype=f32) + 2.0 * alpha
            second = polys[-2] @ m
            polys.append((first - second) / (n + 1.0))
    basis = jnp.stack(polys, axis=-1).reshape(x.shape[0], -1)   # feature-major (PyTorch)
    poly_out = basis @ poly_w.astype(f32).T
    y = base_out + poly_out
    mu = jnp.mean(y, axis=-1, keepdims=True)
    var = jnp.mean((y - mu) ** 2, axis=-1, keepdims=True)
    y = (y - mu) / (jnp.sqrt(var) + 1e-8)
    return silu(y)


def _run_case(key, batch, fin, fout, order):
    k = jax.random.split(key, 5)
    x = jax.random.normal(k[0], (batch, fin), dtype=jnp.float32)
    base_w = jax.random.uniform(k[1], (fout, fin), jnp.float32, -0.3, 0.3)
    poly_w = jax.random.uniform(k[2], (fout, fin * (order + 1)), jnp.float32, -0.15, 0.15)
    alpha_w = jax.random.uniform(k[3], (fin, fin), jnp.float32, -0.3, 0.3)
    bias = jax.random.uniform(k[4], (fin,), jnp.float32, -0.3, 0.3)

    params = prepare_ggb_params(base_w, poly_w, alpha_w, bias,
                                polynomial_order=order, compute_dtype=jnp.bfloat16)
    out = ggb_layer_forward(x, params, in_features=fin, out_features=fout,
                            polynomial_order=order, use_bias=True,
                            compute_dtype=jnp.bfloat16)
    out = jax.block_until_ready(out)
    assert out.shape == (batch, fout)
    assert bool(jnp.isfinite(out).all())

    ref = _reference_original(x, base_w, poly_w, alpha_w, bias,
                              polynomial_order=order, use_bias=True)
    err = float(jnp.max(jnp.abs(out - ref)))
    # Kernel matmul operands are bf16 vs. the f32 original-formulation reference,
    # hence the moderately loose tolerance.
    assert jnp.allclose(out, ref, atol=8e-2, rtol=8e-2), f"max abs err {err}"


if __name__ == "__main__":
    key = jax.random.PRNGKey(0)
    k1, k2 = jax.random.split(key)
    # Small config matching the module defaults (single grid step).
    _run_case(k1, batch=8, fin=32, fout=32, order=3)
    # Larger batch exercising the parallel batch grid + feature/output padding.
    _run_case(k2, batch=384, fin=48, fout=80, order=3)
    print("KERNEL_OK")
</pallas_src>

<mosaic_0001>
module attributes {stable_mosaic.version = 11 : i64} {
  func.func @_ggb_kernel(%arg0: i32, %arg1: memref<2xf32, #tpu.memory_space<smem>>, %arg2: memref<8x32xf32, #tpu.memory_space<vmem>>, %arg3: memref<128x128xbf16, #tpu.memory_space<vmem>>, %arg4: memref<384x128xbf16, #tpu.memory_space<vmem>>, %arg5: memref<128x128xbf16, #tpu.memory_space<vmem>>, %arg6: memref<128x128xbf16, #tpu.memory_space<vmem>>, %arg7: memref<1x128xf32, #tpu.memory_space<vmem>>, %arg8: memref<1x128xf32, #tpu.memory_space<vmem>>, %arg9: memref<1x128xf32, #tpu.memory_space<vmem>>, %arg10: memref<8x128xf32, #tpu.memory_space<vmem>>, %arg11: memref<8x128xf32, #tpu.memory_space<vmem>>, %arg12: memref<8x384xbf16, #tpu.memory_space<vmem>>) attributes {dimension_semantics = [#tpu.dimension_semantics<parallel>], iteration_bounds = array<i64: 1>, scalar_prefetch = 0 : i64, scratch_operands = 2 : i64, tpu.core_type = #tpu.core_type<tc>, window_params = [{transform_indices = @transform_0, window_bounds = array<i64: 2>}, {transform_indices = @transform_1, window_bounds = array<i64: 8, 32>}, {pipeline_mode = #tpu.pipeline_mode<synchronous>, transform_indices = @transform_2, window_bounds = array<i64: 128, 128>}, {pipeline_mode = #tpu.pipeline_mode<synchronous>, transform_indices = @transform_3, window_bounds = array<i64: 384, 128>}, {pipeline_mode = #tpu.pipeline_mode<synchronous>, transform_indices = @transform_4, window_bounds = array<i64: 128, 128>}, {pipeline_mode = #tpu.pipeline_mode<synchronous>, transform_indices = @transform_5, window_bounds = array<i64: 128, 128>}, {pipeline_mode = #tpu.pipeline_mode<synchronous>, transform_indices = @transform_6, window_bounds = array<i64: 1, 128>}, {pipeline_mode = #tpu.pipeline_mode<synchronous>, transform_indices = @transform_7, window_bounds = array<i64: 1, 128>}, {pipeline_mode = #tpu.pipeline_mode<synchronous>, transform_indices = @transform_8, window_bounds = array<i64: 1, 128>}, {transform_indices = @transform_9, window_bounds = array<i64: 8, 128>}]} {
    %cst = arith.constant 0.000000e+00 : f32
    %0 = vector.broadcast %cst : f32 to vector<8x128xf32>
    %c0 = arith.constant 0 : index
    %c0_0 = arith.constant 0 : index
    %1 = vector.load %arg11[%c0, %c0_0] : memref<8x128xf32, #tpu.memory_space<vmem>>, vector<8x128xf32>
    tpu.vector_store %arg11[%c0, %c0_0], %0 {strides = array<i32>} : memref<8x128xf32, #tpu.memory_space<vmem>>, vector<8x128xf32>,
    %c0_1 = arith.constant 0 : index
    %c0_2 = arith.constant 0 : index
    %2 = vector.load %arg2[%c0_1, %c0_2] : memref<8x32xf32, #tpu.memory_space<vmem>>, vector<8x32xf32>
    %c0_3 = arith.constant 0 : index
    %c0_4 = arith.constant 0 : index
    %3 = vector.load %arg11[%c0_3, %c0_4] : memref<8x128xf32, #tpu.memory_space<vmem>>, vector<8x32xf32>
    tpu.vector_store %arg11[%c0_3, %c0_4], %2 {strides = array<i32>} : memref<8x128xf32, #tpu.memory_space<vmem>>, vector<8x32xf32>,
    %c0_5 = arith.constant 0 : index
    %c0_6 = arith.constant 0 : index
    %4 = vector.load %arg11[%c0_5, %c0_6] : memref<8x128xf32, #tpu.memory_space<vmem>>, vector<8x128xf32>
    %5 = arith.negf %4 : vector<8x128xf32>
    %6 = math.exp %5 : vector<8x128xf32>
    %cst_7 = arith.constant 1.000000e+00 : f32
    %7 = vector.broadcast %cst_7 : f32 to vector<8x128xf32>
    %8 = arith.addf %7, %6 : vector<8x128xf32>
    %9 = arith.divf %7, %8 : vector<8x128xf32>
    %10 = arith.mulf %4, %9 : vector<8x128xf32>
    %11 = arith.truncf %10 : vector<8x128xf32> to vector<8x128xbf16>
    %c0_8 = arith.constant 0 : index
    %c0_9 = arith.constant 0 : index
    %12 = vector.load %arg3[%c0_8, %c0_9] : memref<128x128xbf16, #tpu.memory_space<vmem>>, vector<128x128xbf16>
    %cst_10 = arith.constant dense<0.000000e+00> : vector<8x128xf32>
    %13 = tpu.matmul %11, %12, %cst_10 {dimension_numbers = #tpu.dot_dimension_numbers<[1], [0], [0], [1], [0, 0, 1, 1], [], []>} : vector<8x128xbf16>, vector<128x128xbf16>, vector<8x128xf32> -> vector<8x128xf32>
    %c0_11 = arith.constant 0 : index
    %c0_12 = arith.constant 0 : index
    %14 = vector.load %arg8[%c0_11, %c0_12] : memref<1x128xf32, #tpu.memory_space<vmem>>, vector<1x128xf32>
    %15 = vector.broadcast %14 : vector<1x128xf32> to vector<8x128xf32>
    %16 = arith.addf %13, %15 : vector<8x128xf32>
    %c0_13 = arith.constant 0 : index
    %17 = memref.load %arg1[%c0_13] : memref<2xf32, #tpu.memory_space<smem>>
    %c1 = arith.constant 1 : index
    %18 = memref.load %arg1[%c1] : memref<2xf32, #tpu.memory_space<smem>>
    %19 = vector.broadcast %17 : f32 to vector<8x128xf32>
    %20 = arith.subf %4, %19 : vector<8x128xf32>
    %cst_14 = arith.constant 2.000000e+00 : f32
    %21 = vector.broadcast %cst_14 : f32 to vector<8x128xf32>
    %22 = arith.mulf %21, %20 : vector<8x128xf32>
    %23 = arith.subf %18, %17 : f32
    %cst_15 = arith.constant 9.99999993E-9 : f32
    %24 = arith.addf %23, %cst_15 : f32
    %25 = vector.broadcast %24 : f32 to vector<8x128xf32>
    %26 = arith.divf %22, %25 : vector<8x128xf32>
    %cst_16 = arith.constant 1.000000e+00 : f32
    %27 = vector.broadcast %cst_16 : f32 to vector<8x128xf32>
    %28 = arith.subf %26, %27 : vector<8x128xf32>
    %29 = arith.truncf %28 : vector<8x128xf32> to vector<8x128xbf16>
    %c0_17 = arith.constant 0 : index
    %c0_18 = arith.constant 0 : index
    %30 = vector.load %arg5[%c0_17, %c0_18] : memref<128x128xbf16, #tpu.memory_space<vmem>>, vector<128x128xbf16>
    %cst_19 = arith.constant dense<0.000000e+00> : vector<8x128xf32>
    %31 = tpu.matmul %29, %30, %cst_19 {dimension_numbers = #tpu.dot_dimension_numbers<[1], [0], [0], [1], [0, 0, 1, 1], [], []>} : vector<8x128xbf16>, vector<128x128xbf16>, vector<8x128xf32> -> vector<8x128xf32>
    %c0_20 = arith.constant 0 : index
    %c0_21 = arith.constant 0 : index
    %32 = vector.load %arg7[%c0_20, %c0_21] : memref<1x128xf32, #tpu.memory_space<vmem>>, vector<1x128xf32>
    %33 = vector.broadcast %32 : vector<1x128xf32> to vector<8x128xf32>
    %34 = arith.addf %31, %33 : vector<8x128xf32>
    %cst_22 = arith.constant 2.000000e+00 : f32
    %35 = vector.broadcast %cst_22 : f32 to vector<8x128xf32>
    %36 = arith.mulf %35, %34 : vector<8x128xf32>
    %37 = arith.truncf %36 : vector<8x128xf32> to vector<8x128xbf16>
    %c0_23 = arith.constant 0 : index
    %c0_24 = arith.constant 0 : index
    %38 = vector.load %arg12[%c0_23, %c0_24] : memref<8x384xbf16, #tpu.memory_space<vmem>>, vector<8x128xbf16>
    tpu.vector_store %arg12[%c0_23, %c0_24], %37 {strides = array<i32>} : memref<8x384xbf16, #tpu.memory_space<vmem>>, vector<8x128xbf16>,
    %cst_25 = arith.constant 1.000000e+00 : f32
    %39 = vector.broadcast %cst_25 : f32 to vector<8x128xf32>
    %40 = arith.mulf %39, %28 : vector<8x128xf32>
    %41 = arith.addf %40, %31 : vector<8x128xf32>
    %cst_26 = arith.constant 2.000000e+00 : f32
    %42 = vector.broadcast %cst_26 : f32 to vector<8x128xf32>
    %43 = arith.mulf %42, %41 : vector<8x128xf32>
    %44 = arith.mulf %43, %36 : vector<8x128xf32>
    %c0_27 = arith.constant 0 : index
    %c0_28 = arith.constant 0 : index
    %45 = vector.load %arg9[%c0_27, %c0_28] : memref<1x128xf32, #tpu.memory_space<vmem>>, vector<1x128xf32>
    %46 = vector.broadcast %45 : vector<1x128xf32> to vector<8x128xf32>
    %47 = arith.subf %44, %46 : vector<8x128xf32>
    %cst_29 = arith.constant 2.000000e+00 : f32
    %48 = vector.broadcast %cst_29 : f32 to vector<8x128xf32>
    %49 = arith.divf %47, %48 : vector<8x128xf32>
    %50 = arith.truncf %49 : vector<8x128xf32> to vector<8x128xbf16>
    %c0_30 = arith.constant 0 : index
    %c128 = arith.constant 128 : index
    %51 = vector.load %arg12[%c0_30, %c128] : memref<8x384xbf16, #tpu.memory_space<vmem>>, vector<8x128xbf16>
    tpu.vector_store %arg12[%c0_30, %c128], %50 {strides = array<i32>} : memref<8x384xbf16, #tpu.memory_space<vmem>>, vector<8x128xbf16>,
    %cst_31 = arith.constant 2.000000e+00 : f32
    %52 = vector.broadcast %cst_31 : f32 to vector<8x128xf32>
    %53 = arith.mulf %52, %28 : vector<8x128xf32>
    %54 = arith.addf %53, %31 : vector<8x128xf32>
    %cst_32 = arith.constant 2.000000e+00 : f32
    %55 = vector.broadcast %cst_32 : f32 to vector<8x128xf32>
    %56 = arith.mulf %55, %54 : vector<8x128xf32>
    %57 = arith.mulf %56, %49 : vector<8x128xf32>
    %cst_33 = arith.constant 1.000000e+00 : f32
    %58 = vector.broadcast %cst_33 : f32 to vector<8x128xf32>
    %59 = arith.mulf %58, %36 : vector<8x128xf32>
    %c0_34 = arith.constant 0 : index
    %c0_35 = arith.constant 0 : index
    %60 = vector.load %arg6[%c0_34, %c0_35] : memref<128x128xbf16, #tpu.memory_space<vmem>>, vector<128x128xbf16>
    %cst_36 = arith.constant dense<0.000000e+00> : vector<8x128xf32>
    %61 = tpu.matmul %37, %60, %cst_36 {dimension_numbers = #tpu.dot_dimension_numbers<[1], [0], [0], [1], [0, 0, 1, 1], [], []>} : vector<8x128xbf16>, vector<128x128xbf16>, vector<8x128xf32> -> vector<8x128xf32>
    %cst_37 = arith.constant 2.000000e+00 : f32
    %62 = vector.broadcast %cst_37 : f32 to vector<8x128xf32>
    %63 = arith.mulf %62, %61 : vector<8x128xf32>
    %64 = arith.addf %59, %63 : vector<8x128xf32>
    %65 = arith.subf %57, %64 : vector<8x128xf32>
    %cst_38 = arith.constant 3.000000e+00 : f32
    %66 = vector.broadcast %cst_38 : f32 to vector<8x128xf32>
    %67 = arith.divf %65, %66 : vector<8x128xf32>
    %68 = arith.truncf %67 : vector<8x128xf32> to vector<8x128xbf16>
    %c0_39 = arith.constant 0 : index
    %c256 = arith.constant 256 : index
    %69 = vector.load %arg12[%c0_39, %c256] : memref<8x384xbf16, #tpu.memory_space<vmem>>, vector<8x128xbf16>
    tpu.vector_store %arg12[%c0_39, %c256], %68 {strides = array<i32>} : memref<8x384xbf16, #tpu.memory_space<vmem>>, vector<8x128xbf16>,
    %c0_40 = arith.constant 0 : index
    %c0_41 = arith.constant 0 : index
    %70 = vector.load %arg12[%c0_40, %c0_41] : memref<8x384xbf16, #tpu.memory_space<vmem>>, vector<8x384xbf16>
    %c0_42 = arith.constant 0 : index
    %c0_43 = arith.constant 0 : index
    %71 = vector.load %arg4[%c0_42, %c0_43] : memref<384x128xbf16, #tpu.memory_space<vmem>>, vector<384x128xbf16>
    %cst_44 = arith.constant dense<0.000000e+00> : vector<8x128xf32>
    %72 = tpu.matmul %70, %71, %cst_44 {dimension_numbers = #tpu.dot_dimension_numbers<[1], [0], [0], [1], [0, 0, 1, 1], [], []>} : vector<8x384xbf16>, vector<384x128xbf16>, vector<8x128xf32> -> vector<8x128xf32>
    %73 = arith.addf %16, %72 : vector<8x128xf32>
    %cst_45 = arith.constant dense<0.000000e+00> : vector<8xf32>
    %74 = vector.multi_reduction <add>, %73, %cst_45 [1] : vector<8x128xf32> to vector<8xf32>
    %75 = vector.shape_cast %74 : vector<8xf32> to vector<8x1xf32>
    %cst_46 = arith.constant 3.125000e-02 : f32
    %76 = vector.broadcast %cst_46 : f32 to vector<8x1xf32>
    %77 = arith.mulf %75, %76 : vector<8x1xf32>
    %78 = vector.broadcast %77 : vector<8x1xf32> to vector<8x128xf32>
    %79 = arith.subf %73, %78 : vector<8x128xf32>
    %80 = tpu.iota {dimensions = array<i32: 1>} : vector<8x128xi32>
    %c32_i32 = arith.constant 32 : i32
    %81 = vector.broadcast %c32_i32 : i32 to vector<8x128xi32>
    %82 = arith.cmpi slt, %80, %81 : vector<8x128xi32>
    %83 = arith.mulf %79, %79 : vector<8x128xf32>
    %cst_47 = arith.constant 0.000000e+00 : f32
    %84 = vector.broadcast %cst_47 : f32 to vector<8x128xf32>
    %85 = arith.select %82, %83, %84 : vector<8x128xi1>, vector<8x128xf32>
    %cst_48 = arith.constant dense<0.000000e+00> : vector<8xf32>
    %86 = vector.multi_reduction <add>, %85, %cst_48 [1] : vector<8x128xf32> to vector<8xf32>
    %87 = vector.shape_cast %86 : vector<8xf32> to vector<8x1xf32>
    %cst_49 = arith.constant 3.125000e-02 : f32
    %88 = vector.broadcast %cst_49 : f32 to vector<8x1xf32>
    %89 = arith.mulf %87, %88 : vector<8x1xf32>
    %90 = math.sqrt %89 : vector<8x1xf32>
    %cst_50 = arith.constant 9.99999993E-9 : f32
    %91 = vector.broadcast %cst_50 : f32 to vector<8x1xf32>
    %92 = arith.addf %90, %91 : vector<8x1xf32>
    %cst_51 = arith.constant 1.000000e+00 : f32
    %93 = vector.broadcast %cst_51 : f32 to vector<8x1xf32>
    %94 = arith.divf %93, %92 : vector<8x1xf32>
    %95 = vector.broadcast %94 : vector<8x1xf32> to vector<8x128xf32>
    %96 = arith.mulf %79, %95 : vector<8x128xf32>
    %97 = arith.negf %96 : vector<8x128xf32>
    %98 = math.exp %97 : vector<8x128xf32>
    %cst_52 = arith.constant 1.000000e+00 : f32
    %99 = vector.broadcast %cst_52 : f32 to vector<8x128xf32>
    %100 = arith.addf %99, %98 : vector<8x128xf32>
    %101 = arith.divf %99, %100 : vector<8x128xf32>
    %102 = arith.mulf %96, %101 : vector<8x128xf32>
    %c0_53 = arith.constant 0 : index
    %c0_54 = arith.constant 0 : index
    %103 = vector.load %arg10[%c0_53, %c0_54] : memref<8x128xf32, #tpu.memory_space<vmem>>, vector<8x128xf32>
    tpu.vector_store %arg10[%c0_53, %c0_54], %102 {strides = array<i32>} : memref<8x128xf32, #tpu.memory_space<vmem>>, vector<8x128xf32>,
    return
  }
  func.func @transform_0(%arg0: i32) -> i32 {
    %c0_i32 = arith.constant 0 : i32
    %c0_i32_0 = arith.constant 0 : i32
    return %c0_i32 : i32
  }
  func.func @transform_1(%arg0: i32) -> (i32, i32) {
    %c0_i32 = arith.constant 0 : i32
    %c0_i32_0 = arith.constant 0 : i32
    return %arg0, %c0_i32 : i32, i32
  }
  func.func @transform_2(%arg0: i32) -> (i32, i32) {
    %c0_i32 = arith.constant 0 : i32
    %c0_i32_0 = arith.constant 0 : i32
    %c0_i32_1 = arith.constant 0 : i32
    return %c0_i32, %c0_i32_0 : i32, i32
  }
  func.func @transform_3(%arg0: i32) -> (i32, i32) {
    %c0_i32 = arith.constant 0 : i32
    %c0_i32_0 = arith.constant 0 : i32
    %c0_i32_1 = arith.constant 0 : i32
    return %c0_i32, %c0_i32_0 : i32, i32
  }
  func.func @transform_4(%arg0: i32) -> (i32, i32) {
    %c0_i32 = arith.constant 0 : i32
    %c0_i32_0 = arith.constant 0 : i32
    %c0_i32_1 = arith.constant 0 : i32
    return %c0_i32, %c0_i32_0 : i32, i32
  }
  func.func @transform_5(%arg0: i32) -> (i32, i32) {
    %c0_i32 = arith.constant 0 : i32
    %c0_i32_0 = arith.constant 0 : i32
    %c0_i32_1 = arith.constant 0 : i32
    return %c0_i32, %c0_i32_0 : i32, i32
  }
  func.func @transform_6(%arg0: i32) -> (i32, i32) {
    %c0_i32 = arith.constant 0 : i32
    %c0_i32_0 = arith.constant 0 : i32
    %c0_i32_1 = arith.constant 0 : i32
    return %c0_i32, %c0_i32_0 : i32, i32
  }
  func.func @transform_7(%arg0: i32) -> (i32, i32) {
    %c0_i32 = arith.constant 0 : i32
    %c0_i32_0 = arith.constant 0 : i32
    %c0_i32_1 = arith.constant 0 : i32
    return %c0_i32, %c0_i32_0 : i32, i32
  }
  func.func @transform_8(%arg0: i32) -> (i32, i32) {
    %c0_i32 = arith.constant 0 : i32
    %c0_i32_0 = arith.constant 0 : i32
    %c0_i32_1 = arith.constant 0 : i32
    return %c0_i32, %c0_i32_0 : i32, i32
  }
  func.func @transform_9(%arg0: i32) -> (i32, i32) {
    %c0_i32 = arith.constant 0 : i32
    %c0_i32_0 = arith.constant 0 : i32
    return %arg0, %c0_i32 : i32, i32
  }
}

</mosaic_0001>

<bundles_post_ra>
// kernel: ggb_layer_forward.1
= control target key start
LH: loop header
LB: loop body
LE: loop exit
PB: predicated region body
PF: predicated region fallthrough
CT: control target
= control target key end

     0   :  { %14 = vsyncpa [#allocation7], 0  ;;  %s1364_s0 = inlined_call_operand.vmem [shape: f32[2], index: 0, kind: input, shape index: {}]   ;;  %s1365_s1 = inlined_call_operand.vmem [shape: f32[8,32], index: 1, kind: input, shape index: {}]   ;;  %s1366_s2 = inlined_call_operand.hbm [shape: bf16[128,128], index: 2, kind: input, shape index: {}]   ;;  %s1367_s3 = inlined_call_operand.hbm [shape: bf16[384,128], index: 3, kind: input, shape index: {}]   ;;  %s1368_s4 = inlined_call_operand.hbm [shape: bf16[128,128], index: 4, kind: input, shape index: {}]   ;;  %s1369_s5 = inlined_call_operand.hbm [shape: bf16[128,128], index: 5, kind: input, shape index: {}]   ;;  %s1370_s6 = inlined_call_operand.vmem [shape: f32[1,128], index: 6, kind: input, shape index: {}]   ;;  %s1371_s7 = inlined_call_operand.vmem [shape: f32[1,128], index: 7, kind: input, shape index: {}]   ;;  %s1372_s8 = inlined_call_operand.vmem [shape: f32[1,128], index: 8, kind: input, shape index: {}]   ;;  %s1373_s9 = inlined_call_operand.hbm [shape: f32[8,128], index: 9, kind: output, shape index: {}]  }
   0x1   :  { %15 = vsyncpa [#allocation5], 0 }
   0x2   :  { %16 = vsyncpa [#allocation10], 0 }
   0x3   :  { %17 = vsyncpa [#allocation13], 0 }
   0x4   :  { %18 = vsyncpa [#allocation6], 0  ;;  %s25_s11 = sshll.u32 %s1364_s0, 4  ;;  %s1211_s12 = smov [#allocation9]   ;;  %s26_s11 = int_to_ptr.vmem [resolvable:$true] %s25_s11 }
   0x5   :  { %s48_s13 = sshll.u32 %s1211_s12, 4  ;;  %s49_s13 = int_to_ptr.vmem [resolvable:$true] %s48_s13 }
   0x6   :  { %s1097_s14 = scalar_lea.vmem %s49_s13, 3072  ;;  %p1102_p1 = scmp.lt.s32.totalorder %s49_s13, %s49_s13 }
   0x7   :  { %p1098_p0 = scmp.ne.s32.totalorder %s49_s13, %s1097_s14  ;;  %p1103_p2 = scmp.lt.s32.totalorder %s1097_s14, %s1097_s14 }
   0x9   :  { %p1104_p3 = por %p1103_p2, %p1102_p1 }
   0xb   :  { %p1105_p4 = pnand %p1104_p3, %p1098_p0 }
   0xd   :  { %1108 = shalt.err (!%p1105_p4)
}
   0xe   :  { %s1212_s15 = smov 64   ;;  %s1213_s16 = smov 4  }
   0xf   :  { %54 = dma.hbm_to_vmem [thread:$0]  %s1367_s3, 3072, %s49_s13, [#allocation10], %s1212_s15, %s1212_s15, %s1213_s16  }
  0x10   :  { %s1109_s0 = scalar_lea.vmem %s26_s11, 16  ;;  %p1114_p6 = scmp.lt.s32.totalorder %s26_s11, %s26_s11 }
  0x11   :  { %p1110_p5 = scmp.ne.s32.totalorder %s26_s11, %s1109_s0  ;;  %p1115_p7 = scmp.lt.s32.totalorder %s1109_s0, %s1109_s0 }
  0x13   :  { %p1116_p8 = por %p1115_p7, %p1114_p6 }
  0x15   :  { %p1117_p9 = pnand %p1116_p8, %p1110_p5 }
  0x17   :  { %1120 = shalt.err (!%p1117_p9)
}
  0x18   :  { %s1214_s19 = smov [#allocation4]   ;;  %s1215_s20 = smov [#allocation8]  }
  0x19   :  { %28 = dma.vmem_to_smem %s26_s11, 16, %s1214_s19, [#allocation7]  }
  0x1a   :  { %s36_s21 = sshll.u32 %s1215_s20, 4  ;;  %s1216_s22 = smov [#allocation11]   ;;  %s37_s21 = int_to_ptr.vmem [resolvable:$true] %s36_s21 }
  0x1b   :  { %s60_s23 = sshll.u32 %s1216_s22, 4  ;;  %s1129_s24 = scalar_lea.vmem %s37_s21, 1024  ;;  %s61_s23 = int_to_ptr.vmem [resolvable:$true] %s60_s23 }
  0x1c   :  { %p1130_p10 = scmp.ne.s32.totalorder %s37_s21, %s1129_s24  ;;  %p1134_p11 = scmp.lt.s32.totalorder %s37_s21, %s37_s21 }
  0x1d   :  { %p1135_p12 = scmp.lt.s32.totalorder %s1129_s24, %s1129_s24 }
  0x1f   :  { %p1136_p13 = por %p1135_p12, %p1134_p11 }
  0x21   :  { %p1137_p0 = pnand %p1136_p13, %p1130_p10 }
  0x23   :  { %1140 = shalt.err (!%p1137_p0)
}
  0x24   :  { %42 = dma.hbm_to_vmem [thread:$0]  %s1366_s2, 1024, %s37_s21, [#allocation5], %s1212_s15, %s1212_s15, %s1213_s16  }
  0x25   :  { %s1149_s26 = scalar_lea.vmem %s61_s23, 1024  ;;  %p1154_p2 = scmp.lt.s32.totalorder %s61_s23, %s61_s23 }
  0x26   :  { %p1150_p1 = scmp.ne.s32.totalorder %s61_s23, %s1149_s26  ;;  %p1155_p3 = scmp.lt.s32.totalorder %s1149_s26, %s1149_s26 }
  0x28   :  { %p1156_p4 = por %p1155_p3, %p1154_p2 }
  0x2a   :  { %p1157_p5 = pnand %p1156_p4, %p1150_p1 }
  0x2c   :  { %1160 = shalt.err (!%p1157_p5)
}
  0x2d   :  { %66 = dma.hbm_to_vmem [thread:$0]  %s1368_s4, 1024, %s61_s23, [#allocation10], %s1212_s15, %s1212_s15, %s1213_s16  }
  0x2e   :  { %s1217_s29 = smov [#allocation12]  }
  0x2f   :  { %s72_s30 = sshll.u32 %s1217_s29, 4  ;;  %s73_s30 = int_to_ptr.vmem [resolvable:$true] %s72_s30 }
  0x30   :  { %s1169_s10 = scalar_lea.vmem %s73_s30, 1024  ;;  %p1174_p7 = scmp.lt.s32.totalorder %s73_s30, %s73_s30 }
  0x31   :  { %p1170_p6 = scmp.ne.s32.totalorder %s73_s30, %s1169_s10  ;;  %p1175_p8 = scmp.lt.s32.totalorder %s1169_s10, %s1169_s10 }
  0x33   :  { %p1176_p9 = por %p1175_p8, %p1174_p7 }
  0x35   :  { %p1177_p10 = pnand %p1176_p9, %p1170_p6 }
  0x37   :  { %1180 = shalt.err (!%p1177_p10)
}
  0x38   :  { %78 = dma.hbm_to_vmem [thread:$0]  %s1369_s5, 1024, %s73_s30, [#allocation13], %s1212_s15, %s1212_s15, %s1213_s16  }
  0x39   :  { %1201 = dma.done.wait [#allocation7], 16  }
  0x3a   :  { %1202 = vsyncadd [#allocation7], 4294967280 }
  0x3b   :  { %1203 = dma.done.wait [#allocation5], 1024  }
  0x3c   :  { %1204 = vsyncadd [#allocation5], 4294966272 }
  0x3d   :  { %1205 = dma.done.wait [#allocation10], 4096  }
  0x3e   :  { %1206 = vsyncadd [#allocation10], 4294963200 }
  0x3f   :  { %1207 = dma.done.wait [#allocation13], 1024  }
  0x40   :  { %1208 = vsyncadd [#allocation13], 4294966272 }
  0x41   :  { %100 = sfence }
  0x42   :  { %v1024_v0 = vld [vmem:[#allocation11 + $0x38] sm:$0xff]   ;;  %v1218_v1 = vmov 0.0   ;;  %v1025_v2 = vld [vmem:[#allocation11 + $0x30] sm:$0xff]   ;;  %vm1219_vm0 = vmmov 0   ;;  %v1026_v3 = vld [vmem:[#allocation11 + $0x28] sm:$0xff]   ;;  %vm104_vm1 = vcmask 261120  }
  0x43   :  { %954 = vmatprep.subr.bf16.mxu1 %v1218_v1  ;;  %102 = vst [vmem:[#allocation2] sm:$0xff] %v1218_v1  ;;  %934 = vmatprep.subr.bf16.mxu0 %v1218_v1  ;;  %v1027_v4 = vld [vmem:[#allocation11 + $0x20] sm:$0xff]   ;;  %v103_v5 = vld [vmem:[%s1365_s1] sm:$0xff]  ;;  %s1310_s12 = sld [smem:[#allocation4]]  ;;  %v1032_v6 = vld [vmem:[#allocation8 + $0x38] sm:$0xff]  }
  0x44   :  { %955 = vmatpush3.bf16.msra.mxu1 %v1024_v0  ;;  %970 = vmatprep.mubr.msk.bf16.mxu1 %vm1219_vm0, %v1218_v1  ;;  %105 = vst.msk [vmem:[#allocation2] sm:$0xff] %vm104_vm1, %v103_v5  ;;  %s828_s13 = sld [smem:[#allocation4 + $0x1]]  ;;  %v1033_v7 = vld [vmem:[#allocation8 + $0x30] sm:$0xff]   ;;  %v1028_v8 = vld [vmem:[#allocation11 + $0x18] sm:$0xff]   ;;  %v1034_v9 = vld [vmem:[#allocation8 + $0x28] sm:$0xff]  }
  0x45   :  { %956 = vmatprep.subr.bf16.mxu1 %v1218_v1  ;;  %950 = vmatprep.mubr.msk.bf16.mxu0 %vm1219_vm0, %v1218_v1  ;;  %v1029_v10 = vld [vmem:[#allocation11 + $0x10] sm:$0xff]   ;;  %v1035_v13 = vld [vmem:[#allocation8 + $0x20] sm:$0xff]   ;;  %v1030_v16 = vld [vmem:[#allocation11 + $0x8] sm:$0xff]  }
  0x46   :  { %935 = vmatpush3.bf16.msra.mxu0 %v1032_v6  ;;  %v1036_v17 = vld [vmem:[#allocation8 + $0x18] sm:$0xff]   ;;  %v1031_v19 = vld [vmem:[#allocation11] sm:$0xff]   ;;  %v1037_v20 = vld [vmem:[#allocation8 + $0x10] sm:$0xff]  }
  0x47   :  { %936 = vmatprep.subr.bf16.mxu0 %v1218_v1  ;;  %v1045_v22 = vld [vmem:[#allocation9 + $0x78] sm:$0xff]   ;;  %v1038_v23 = vld [vmem:[#allocation8 + $0x8] sm:$0xff]   ;;  %v1039_v26 = vld [vmem:[#allocation8] sm:$0xff]  }
  0x48   :  { %957 = vmatpush3.bf16.msra.mxu1 %v1025_v2  ;;  %v1046_v29 = vld [vmem:[#allocation9 + $0x38] sm:$0xff]   ;;  %v1048_v31 = vld [vmem:[#allocation9 + $0x70] sm:$0xff]   ;;  %v1042_v39 = vld [vmem:[#allocation12 + $0x28] sm:$0xff]  }
  0x49   :  { %958 = vmatprep.subr.bf16.mxu1 %v1218_v1  ;;  %v228_v15 = vstv %s1310_s12  ;;  %v1049_v33 = vld [vmem:[#allocation9 + $0x30] sm:$0xff]   ;;  %v1040_v36 = vld [vmem:[#allocation12 + $0x38] sm:$0xff]   ;;  %v1043_v40 = vld [vmem:[#allocation12 + $0x20] sm:$0xff]  }
  0x4a   :  { %937 = vmatpush3.bf16.msra.mxu0 %v1033_v7  ;;  %s231_s1 = ssub.f32 %s828_s13, %s1310_s12  ;;  %v1041_v38 = vld [vmem:[#allocation12 + $0x30] sm:$0xff]   ;;  %v1044_v41 = vld [vmem:[#allocation12 + $0x18] sm:$0xff]   ;;  %v1050_v43 = vld [vmem:[#allocation12 + $0x8] sm:$0xff]  }
  0x4b   :  { %938 = vmatprep.subr.bf16.mxu0 %v1218_v1  ;;  %v106_v11 = vld [vmem:[#allocation2] sm:$0xff]  ;;  %v1053_v46 = vld [vmem:[#allocation12] sm:$0xff]   ;;  %v1056_v49 = vld [vmem:[#allocation9 + $0x58] sm:$0xff]  }
  0x4c   :  { %959 = vmatpush3.bf16.msra.mxu1 %v1026_v3  ;;  %v818_v12 = vmul.f32 -1.442695, %v106_v11  ;;  %s232_s14 = sadd.f32 1e-08, %s231_s1  ;;  %v229_v18 = vsub.f32 %v106_v11, %v228_v15  ;;  %v1047_v42 = vld [vmem:[#allocation12 + $0x10] sm:$0xff]   ;;  %v1051_v44 = vld [vmem:[#allocation9 + $0x68] sm:$0xff]  }
  0x4d   :  { %960 = vmatprep.subr.bf16.mxu1 %v1218_v1  ;;  %v1052_v45 = vld [vmem:[#allocation9 + $0x28] sm:$0xff]   ;;  %v1054_v47 = vld [vmem:[#allocation9 + $0x60] sm:$0xff]   ;;  %v1057_v50 = vld [vmem:[#allocation9 + $0x18] sm:$0xff]  }
  0x4e   :  { %939 = vmatpush3.bf16.msra.mxu0 %v1034_v9  ;;  %1075 = vpow2.f32 %v818_v12  ;;  %v233_v14 = vstv %s232_s14  ;;  %v230_v21 = vmul.f32 2.0, %v229_v18  ;;  %v1055_v48 = vld [vmem:[#allocation9 + $0x20] sm:$0xff]   ;;  %v1058_v51 = vld [vmem:[#allocation9 + $0x50] sm:$0xff]   ;;  %v1060_v53 = vld [vmem:[#allocation9 + $0x48] sm:$0xff]  }
  0x4f   :  { %940 = vmatprep.subr.bf16.mxu0 %v1218_v1  ;;  %1077 = vrcp.f32 %v233_v14  ;;  %v1059_v52 = vld [vmem:[#allocation9 + $0x10] sm:$0xff]   ;;  %v1061_v54 = vld [vmem:[#allocation9 + $0x8] sm:$0xff]   ;;  %v1062_v55 = vld [vmem:[#allocation9 + $0x40] sm:$0xff]  }
  0x50   :  { %961 = vmatpush3.bf16.msra.mxu1 %v1027_v4  ;;  %v1063_v56 = vld [vmem:[#allocation9] sm:$0xff]   ;;  %v838_v57 = vld [vmem:[%s1370_s6] ss:$0 sm:$0xff]  ;;  %v1066_v4 = vld [vmem:[#allocation9 + $0xb8] sm:$0xff]  }
  0x51   :  { %962 = vmatprep.subr.bf16.mxu1 %v1218_v1  ;;  %v839_v2 = vld [vmem:[%s1372_s8] ss:$0 sm:$0xff] }
  0x52   :  { %941 = vmatpush3.bf16.msra.mxu0 %v1035_v13  ;;  %v1068_v15 = vld [vmem:[#allocation9 + $0xa8] sm:$0xff]  }
  0x53   :  { %942 = vmatprep.subr.bf16.mxu0 %v1218_v1 }
  0x54   :  { %963 = vmatpush3.bf16.msra.mxu1 %v1028_v8 }
  0x55   :  { %964 = vmatprep.subr.bf16.mxu1 %v1218_v1 }
  0x56   :  { %943 = vmatpush3.bf16.msra.mxu0 %v1036_v17 }
  0x57   :  { %944 = vmatprep.subr.bf16.mxu0 %v1218_v1 }
  0x58   :  { %965 = vmatpush3.bf16.msra.mxu1 %v1029_v10  ;;  %v1067_v10 = vld [vmem:[#allocation9 + $0xb0] sm:$0xff]  }
  0x59   :  { %966 = vmatprep.subr.bf16.mxu1 %v1218_v1 }
  0x5a   :  { %945 = vmatpush3.bf16.msra.mxu0 %v1037_v20 }
  0x5b   :  { %946 = vmatprep.subr.bf16.mxu0 %v1218_v1  ;;  %v1076_v24 = vpop.eup %1075 }
  0x5c   :  { %967 = vmatpush3.bf16.msra.mxu1 %v1030_v16  ;;  %v1078_v25 = vpop.eup %1077  ;;  %v110_v27 = vadd.f32 1.0, %v1076_v24  ;;  %v1070_v24 = vld [vmem:[#allocation9 + $0x98] sm:$0xff]  }
  0x5d   :  { %968 = vmatprep.subr.bf16.mxu1 %v1218_v1  ;;  %v235_v28 = vmul.f32 %v1078_v25, %v230_v21  ;;  %v1071_v25 = vld [vmem:[#allocation9 + $0x90] sm:$0xff]  }
  0x5e   :  { %947 = vmatpush3.bf16.msra.mxu0 %v1038_v23  ;;  %1079 = vrcp.f32 %v110_v27  ;;  %v1069_v23 = vld [vmem:[#allocation9 + $0xa0] sm:$0xff]  }
  0x5f   :  { %948 = vmatprep.subr.bf16.mxu0 %v1218_v1  ;;  %v1326_v30 = vadd.f32 -1.0, %v235_v28  ;;  %v1073_v27 = vld [vmem:[#allocation9 + $0x80] sm:$0xff]  }
  0x60   :  { %969 = vmatpush3.bf16.msra.mxu1 %v1031_v19 }
  0x61   :  { %903 = vmatprep.subr.bf16.mxu1 %v1045_v22  ;;  %v237_v32 = vpack.c.bf16 %v1326_v30, %v1326_v30  ;;  %v368_v61 = vmul.f32 2.0, %v1326_v30 }
  0x62   :  { %949 = vmatpush3.bf16.msra.mxu0 %v1039_v26  ;;  %v1072_v26 = vld [vmem:[#allocation9 + $0x88] sm:$0xff]  }
  0x63   :  { %974 = vmatprep.subr.bf16.mxu0 %v1218_v1  ;;  %971 = vmatmul.mubr.bf16.vlgmr.msra.gmra.mxu1 %v237_v32 }
  0x64   :  { %904 = vmatpush3.bf16.msra.mxu1 %v1046_v29 }
  0x65   :  { %905 = vmatprep.subr.bf16.mxu1 %v1048_v31 }
  0x68   :  { %906 = vmatpush3.bf16.msra.mxu1 %v1049_v33 }
  0x69   :  { %907 = vmatprep.subr.bf16.mxu1 %v1051_v44 }
  0x6b   :  { %v1080_v34 = vpop.eup %1079 }
  0x6c   :  { %v113_v35 = vmul.f32 %v1080_v34, %v106_v11  ;;  %908 = vmatpush3.bf16.msra.mxu1 %v1052_v45 }
  0x6d   :  { %909 = vmatprep.subr.bf16.mxu1 %v1054_v47 }
  0x6e   :  { %v114_v37 = vpack.c.bf16 %v113_v35, %v113_v35 }
  0x70   :  { %951 = vmatmul.mubr.bf16.vlgmr.msra.gmra.mxu0 %v114_v37  ;;  %910 = vmatpush3.bf16.msra.mxu1 %v1055_v48 }
  0x71   :  { %975 = vmatpush3.bf16.msra.mxu0 %v1040_v36  ;;  %990 = vmatprep.mubr.msk.bf16.mxu0 %vm1219_vm0, %v1218_v1 }
  0x72   :  { %976 = vmatprep.subr.bf16.mxu0 %v1218_v1  ;;  %911 = vmatprep.subr.bf16.mxu1 %v1056_v49 }
  0x74   :  { %912 = vmatpush3.bf16.msra.mxu1 %v1057_v50  ;;  %v773_v50 = vlaneseq }
  0x75   :  { %977 = vmatpush3.bf16.msra.mxu0 %v1041_v38  ;;  %913 = vmatprep.subr.bf16.mxu1 %v1058_v51 }
  0x76   :  { %978 = vmatprep.subr.bf16.mxu0 %v1218_v1 }
  0x78   :  { %914 = vmatpush3.bf16.msra.mxu1 %v1059_v52  ;;  %v774_v52 = vand.u32 127, %v773_v50 }
  0x79   :  { %979 = vmatpush3.bf16.msra.mxu0 %v1042_v39  ;;  %915 = vmatprep.subr.bf16.mxu1 %v1060_v53 }
  0x7a   :  { %980 = vmatprep.subr.bf16.mxu0 %v1218_v1  ;;  %vm775_vm2 = vcmp.lt.s32.totalorder %v774_v52, 32 }
  0x7c   :  { %916 = vmatpush3.bf16.msra.mxu1 %v1061_v54 }
  0x7d   :  { %981 = vmatpush3.bf16.msra.mxu0 %v1043_v40  ;;  %917 = vmatprep.subr.bf16.mxu1 %v1062_v55 }
  0x7e   :  { %982 = vmatprep.subr.bf16.mxu0 %v1218_v1 }
  0x80   :  { %918 = vmatpush3.bf16.msra.mxu1 %v1063_v56 }
  0x81   :  { %983 = vmatpush3.bf16.msra.mxu0 %v1044_v41 }
  0x82   :  { %984 = vmatprep.subr.bf16.mxu0 %v1218_v1 }
  0x85   :  { %985 = vmatpush3.bf16.msra.mxu0 %v1047_v42 }
  0x86   :  { %986 = vmatprep.subr.bf16.mxu0 %v1218_v1 }
  0x89   :  { %987 = vmatpush3.bf16.msra.mxu0 %v1050_v43 }
  0x8a   :  { %988 = vmatprep.subr.bf16.mxu0 %v1218_v1 }
  0x8d   :  { %989 = vmatpush3.bf16.msra.mxu0 %v1053_v46 }
  0x8e   :  { %994 = vmatprep.subr.bf16.mxu0 %v1218_v1 }
 0x123   :  { %v336_v58 = vpop.f32.mrf.mxu1 }
 0x124   :  { %v349_v59 = vadd.f32 %v838_v57, %v336_v58  ;;  %v353_v60 = vadd.f32 %v1326_v30, %v336_v58  ;;  %v369_v6 = vadd.f32 %v368_v61, %v336_v58 }
 0x125   :  { %v972_v62 = vpop.f32.mrf.mxu1 }
 0x126   :  { %v350_v63 = vmul.f32 2.0, %v349_v59  ;;  %v354_v0 = vmul.f32 2.0, %v353_v60  ;;  %v370_v12 = vmul.f32 2.0, %v369_v6 }
 0x127   :  { %v339_v3 = vpop.f32.mrf.mxu1 }
 0x128   :  { %v355_v5 = vmul.f32 %v354_v0, %v350_v63  ;;  %v351_v7 = vpack.c.bf16 %v350_v63, %v350_v63 }
 0x129   :  { %v973_v8 = vpop.f32.mrf.mxu1 }
 0x12a   :  { %v363_v9 = vsub.f32 %v355_v5, %v839_v2  ;;  %352 = vst [vmem:[#allocation3] sm:$0xf] %v351_v7  ;;  %991 = vmatmul.mubr.bf16.vlgmr.msra.gmra.mxu0 %v351_v7 }
 0x12b   :  { %995 = vmatpush3.bf16.msra.mxu0 %v1066_v4  ;;  %1010 = vmatprep.mubr.msk.bf16.mxu0 %vm1219_vm0, %v1218_v1 }
 0x12c   :  { %v365_v11 = vmul.f32 0.5, %v363_v9  ;;  %996 = vmatprep.subr.bf16.mxu0 %v1218_v1 }
 0x12e   :  { %v366_v13 = vpack.c.bf16 %v365_v11, %v365_v11  ;;  %v371_v14 = vmul.f32 %v370_v12, %v365_v11 }
 0x12f   :  { %997 = vmatpush3.bf16.msra.mxu0 %v1067_v10 }
 0x130   :  { %367 = vst [vmem:[#allocation3 + $0x4] sm:$0xf] %v366_v13  ;;  %v220_v16 = vpop.f32.mrf.mxu0  ;;  %998 = vmatprep.subr.bf16.mxu0 %v1218_v1 }
 0x132   :  { %v952_v17 = vpop.f32.mrf.mxu0 }
 0x133   :  { %999 = vmatpush3.bf16.msra.mxu0 %v1068_v15 }
 0x134   :  { %v223_v18 = vpop.f32.mrf.mxu0  ;;  %1000 = vmatprep.subr.bf16.mxu0 %v1218_v1 }
 0x136   :  { %v953_v19 = vpop.f32.mrf.mxu0 }
 0x137   :  { %v483_v20 = vld [vmem:[#allocation3] sm:$0xff]  ;;  %1001 = vmatpush3.bf16.msra.mxu0 %v1069_v23 }
 0x138   :  { %v848_v21 = vcombine.low %v483_v20, %v483_v20  ;;  %v849_v22 = vcombine.high %v483_v20, %v483_v20  ;;  %1002 = vmatprep.subr.bf16.mxu0 %v1218_v1 }
 0x13a   :  { %720 = vmatprep.mubr.bf16.mxu1 %v849_v22 }
 0x13b   :  { %721 = vmatmul.mubr.bf16.vlgmr.msra.gmra.mxu1 %v848_v21  ;;  %1003 = vmatpush3.bf16.msra.mxu0 %v1070_v24 }
 0x13c   :  { %1004 = vmatprep.subr.bf16.mxu0 %v1218_v1 }
 0x13f   :  { %1005 = vmatpush3.bf16.msra.mxu0 %v1071_v25 }
 0x140   :  { %1006 = vmatprep.subr.bf16.mxu0 %v1218_v1 }
 0x143   :  { %1007 = vmatpush3.bf16.msra.mxu0 %v1072_v26 }
 0x144   :  { %1008 = vmatprep.subr.bf16.mxu0 %v1218_v1  ;;  %v819_v1 = vld [vmem:[%s1371_s7] ss:$0 sm:$0xff]  ;;  %s1220_s7 = smov [#allocation14]  }
 0x145   :  { %v221_v44 = vadd.f32 %v819_v1, %v220_v16  ;;  %s806_s0 = sshll.u32 %s1220_s7, 4  ;;  %s807_s0 = int_to_ptr.vmem [resolvable:$true] %s806_s0 }
 0x146   :  { %s1181_s19 = scalar_lea.vmem %s807_s0, 128  ;;  %p1186_p12 = scmp.lt.s32.totalorder %s807_s0, %s807_s0 }
 0x147   :  { %1009 = vmatpush3.bf16.msra.mxu0 %v1073_v27  ;;  %p1182_p11 = scmp.ne.s32.totalorder %s807_s0, %s1181_s19  ;;  %p1187_p13 = scmp.lt.s32.totalorder %s1181_s19, %s1181_s19 }
 0x149   :  { %p1188_p0 = por %p1187_p13, %p1186_p12 }
 0x14b   :  { %p1189_p1 = pnand %p1188_p0, %p1182_p11 }
 0x1ea   :  { %v470_v28 = vpop.f32.mrf.mxu0 }
 0x1eb   :  { %v476_v29 = vmul.f32 2.0, %v470_v28 }
 0x1ec   :  { %v992_v30 = vpop.f32.mrf.mxu0 }
 0x1ed   :  { %v477_v31 = vadd.f32 %v476_v29, %v350_v63 }
 0x1ee   :  { %v473_v32 = vpop.f32.mrf.mxu0 }
 0x1ef   :  { %v478_v33 = vsub.f32 %v371_v14, %v477_v31 }
 0x1f0   :  { %v993_v34 = vpop.f32.mrf.mxu0 }
 0x1f1   :  { %v480_v35 = vmul.f32 0.33333334, %v478_v33 }
 0x1f3   :  { %v481_v36 = vpack.c.bf16 %v480_v35, %v480_v35 }
 0x1f5   :  { %482 = vst [vmem:[#allocation3 + $0x8] sm:$0xf] %v481_v36 }
 0x1fb   :  { %v919_v37 = vpop.f32.mrf.mxu1 }
 0x1fc   :  { %v1074_v38 = vld [vmem:[#allocation3 + $0x8] ss:$0 sps:$4 sm:$0xff]  }
 0x1fd   :  { %v920_v39 = vpop.f32.mrf.mxu1  ;;  %1011 = vmatmul.mubr.bf16.vlgmr.msra.gmra.mxu0 %v1074_v38 }
 0x1fe   :  { %v921_v40 = vadd.f32 %v920_v39, %v919_v37 }
 0x1ff   :  { %v922_v41 = vpop.f32.mrf.mxu1 }
 0x201   :  { %v923_v42 = vpop.f32.mrf.mxu1 }
 0x2bd   :  { %v762_v43 = vpop.f32.mrf.mxu0 }
 0x2be   :  { %v763_v45 = vadd.f32 %v921_v40, %v762_v43 }
 0x2bf   :  { %v1012_v46 = vpop.f32.mrf.mxu0 }
 0x2c0   :  { %v768_v47 = vadd.f32 %v763_v45, %v221_v44 }
 0x2c1   :  { %v765_v48 = vpop.f32.mrf.mxu0 }
 0x2c2   :  { %769 = vadd.xlane.f32.xlu0 %v768_v47 }
 0x2c3   :  { %v1013_v49 = vpop.f32.mrf.mxu0 }
 0x34b   :  { %v770_v51 = vpop.xlane.xlu0 %769 }
 0x34c   :  { %v771_v53 = vmul.f32 0.03125, %v770_v51 }
 0x34e   :  { %v772_v54 = vsub.f32 %v768_v47, %v771_v53 }
 0x350   :  { %v776_v55 = vmul.f32 %v772_v54, %v772_v54 }
 0x352   :  { %v777_v56 = vsel %vm775_vm2, %v776_v55, 0.0 }
 0x353   :  { %778 = vadd.xlane.f32.xlu0 %v777_v56 }
 0x3dc   :  { %v779_v57 = vpop.xlane.xlu0 %778 }
 0x3dd   :  { %v780_v58 = vmul.f32 0.03125, %v779_v57 }
 0x3df   :  { %1081 = vrsqrt.f32 %v780_v58  ;;  %vm783_vm3 = vcmp.eq.f32.partialorder %v780_v58, inf  ;;  %v786_v61 = vand.u32 2147483648, %v780_v58  ;;  %vm785_vm4 = vcmp.eq.f32.partialorder %v780_v58, 0.0 }
 0x3ec   :  { %v1082_v59 = vpop.eup %1081 }
 0x3ed   :  { %v782_v60 = vmul.f32 %v1082_v59, %v780_v58 }
 0x3ef   :  { %v784_v62 = vsel %vm783_vm3, %v780_v58, %v782_v60 }
 0x3f0   :  { %v787_v63 = vsel %vm785_vm4, %v786_v61, %v784_v62 }
 0x3f1   :  { %v788_v0 = vadd.f32 1e-08, %v787_v63 }
 0x3f3   :  { %1083 = vrcp.f32 %v788_v0 }
 0x400   :  { %v1084_v2 = vpop.eup %1083 }
 0x401   :  { %v791_v3 = vmul.f32 %v1084_v2, %v772_v54 }
 0x403   :  { %v875_v4 = vmul.f32 -1.442695, %v791_v3 }
 0x405   :  { %1085 = vpow2.f32 %v875_v4 }
 0x412   :  { %v1086_v5 = vpop.eup %1085 }
 0x413   :  { %v795_v6 = vadd.f32 1.0, %v1086_v5 }
 0x415   :  { %1087 = vrcp.f32 %v795_v6 }
 0x422   :  { %v1088_v7 = vpop.eup %1087 }
 0x423   :  { %v798_v8 = vmul.f32 %v1088_v7, %v791_v3 }
 0x425   :  { %799 = vst [vmem:[#allocation14] sm:$0xff] %v798_v8 }
 0x426   :  { %1192 = shalt.err (!%p1189_p1)
}
 0x427   :  { %809 = dma.vmem_to_hbm [thread:$0]  %s807_s0, 128, %s1373_s9, [#allocation6]  }
 0x428   :  { %1209 = dma.done.wait [#allocation6], 128  }
 0x429   :  { %1210 = vsyncadd [#allocation6], 4294967168 }
 0x42a   :  { %813 = vsyncpa [#allocation5], 1 }
 0x42b   :  { %814 = vsyncpa [#allocation10], 1 }
 0x42c   :  { %815 = vsyncpa [#allocation13], 1 }
 0x42d   :  { %816 = vsyncpa [#allocation6], 1 }
 0x42e   :  { %817 = vsyncpa [#allocation7], 1 }

</bundles_post_ra>
